<compile_context>
chip_gen: v7x
topology: tpu7x:2x2x1
jax: 0.10.0
libtpu: 0.0.40
codegen_flags: <defaults>
</compile_context>

<pallas_src>
import functools

import jax
import jax.numpy as jnp
from jax.experimental import pallas as pl
from jax.experimental.pallas import tpu as pltpu


def _round_up(v, m):
    return (v + m - 1) // m * m


def _fused_mlp_kernel(x_ref, *refs):
    """Fused bias-free MLP: chained MXU matmuls, intermediates stay on-chip.

    refs = (w1_ref, ..., wn_ref, o_ref); all weights are (D_in_p, D_out_p),
    already transposed and lane-padded, so each layer is a plain dot.
    """
    *w_refs, o_ref = refs
    h = x_ref[...]
    for w_ref in w_refs:  # unrolled at trace time (few layers)
        h = jnp.dot(h, w_ref[...], preferred_element_type=jnp.float32)
    o_ref[...] = h.astype(o_ref.dtype)


def init_params(key, layers_width):
    """Weights matching torch.nn.init.normal_(mean=0, std=0.01).

    Returns:
      raw_weights : list of (D_out, D_in) f32  -- PyTorch layout, for reference.
      padded_wts  : list of (D_in_p, D_out_p) f32 -- pre-transposed, zero-padded
                    to lane-dense (multiple-of-128) shapes, for the kernel.
    """
    raw_weights = []
    padded_wts = []
    for i in range(len(layers_width) - 1):
        d_in, d_out = layers_width[i], layers_width[i + 1]
        key, sub = jax.random.split(key)
        w = 0.01 * jax.random.normal(sub, (d_out, d_in), dtype=jnp.float32)
        raw_weights.append(w)
        d_in_p = _round_up(d_in, 128)
        d_out_p = _round_up(d_out, 128)
        wt_p = jnp.zeros((d_in_p, d_out_p), jnp.float32).at[:d_in, :d_out].set(w.T)
        padded_wts.append(wt_p)
    return raw_weights, padded_wts


def linear_n_depth_forward(x, padded_wts, d_out_final):
    """Fused forward pass of the whole linear stack in a single pallas_call."""
    n, d_in = x.shape
    d_in_p = padded_wts[0].shape[0]
    d_out_p = padded_wts[-1].shape[1]

    # Batch tile: multiple of 8 (sublane), capped so a tile comfortably fits
    # VMEM even on v7x (64 MiB); larger batches get a real grid + pipelining.
    tm = min(_round_up(n, 8), 256)
    n_pad = _round_up(n, tm)
    grid = (n_pad // tm,)

    # Lane-dense, sublane-aligned input slab (zero padding is exact for a
    # bias-free linear chain).
    x_p = jnp.zeros((n_pad, d_in_p), x.dtype).at[:n, :d_in].set(x)

    in_specs = [pl.BlockSpec((tm, d_in_p), lambda i: (i, 0))]
    for wt in padded_wts:
        # Constant index_map -> weight block stays resident across batch tiles.
        in_specs.append(pl.BlockSpec(wt.shape, lambda i: (0, 0)))
    out_spec = pl.BlockSpec((tm, d_out_p), lambda i: (i, 0))

    # Advisory cost estimate for the fused custom call.
    flops = 0
    d_prev = d_in_p
    for wt in padded_wts:
        flops += 2 * n_pad * d_prev * wt.shape[1]
        d_prev = wt.shape[1]
    bytes_accessed = 4 * (x_p.size + sum(w.size for w in padded_wts) + n_pad * d_out_p)

    out_p = pl.pallas_call(
        _fused_mlp_kernel,
        out_shape=jax.ShapeDtypeStruct((n_pad, d_out_p), x.dtype),
        grid_spec=pl.GridSpec(
            grid=grid,
            in_specs=in_specs,
            out_specs=out_spec,
        ),
        compiler_params=pltpu.CompilerParams(
            # Batch tiles are independent -> megacore sharding on v7x.
            dimension_semantics=("parallel",),
        ),
        cost_estimate=pl.CostEstimate(
            flops=flops, transcendentals=0, bytes_accessed=bytes_accessed
        ),
    )(x_p, *padded_wts)

    # Strip padding back to the logical shape.
    return out_p[:n, :d_out_final]


if __name__ == "__main__":
    key = jax.random.PRNGKey(0)

    layers_width = [32, 64, 48, 16]  # 3 Linear layers, no bias
    batch = 8

    kx, kw = jax.random.split(key)
    x = jax.random.normal(kx, (batch, layers_width[0]), dtype=jnp.float32)
    raw_weights, padded_wts = init_params(kw, layers_width)

    forward = jax.jit(linear_n_depth_forward, static_argnums=(2,))
    out = forward(x, padded_wts, layers_width[-1])
    out = jax.block_until_ready(out)

    # Reference check in plain JAX (same semantics as the PyTorch module).
    ref = x
    for w in raw_weights:
        ref = ref @ w.T
    assert out.shape == (batch, layers_width[-1])
    assert jnp.allclose(out, ref, atol=1e-5, rtol=1e-5)

    print("KERNEL_OK")
</pallas_src>

<mosaic_0001>
module attributes {stable_mosaic.version = 11 : i64} {
  func.func @_fused_mlp_kernel(%arg0: i32, %arg1: memref<8x128xf32, #tpu.memory_space<vmem>>, %arg2: memref<128x128xf32, #tpu.memory_space<vmem>>, %arg3: memref<128x128xf32, #tpu.memory_space<vmem>>, %arg4: memref<128x128xf32, #tpu.memory_space<vmem>>, %arg5: memref<8x128xf32, #tpu.memory_space<vmem>>) attributes {dimension_semantics = [#tpu.dimension_semantics<parallel>], iteration_bounds = array<i64: 1>, scalar_prefetch = 0 : i64, scratch_operands = 0 : i64, tpu.core_type = #tpu.core_type<tc>, window_params = [{transform_indices = @transform_0, window_bounds = array<i64: 8, 128>}, {pipeline_mode = #tpu.pipeline_mode<synchronous>, transform_indices = @transform_1, window_bounds = array<i64: 128, 128>}, {pipeline_mode = #tpu.pipeline_mode<synchronous>, transform_indices = @transform_2, window_bounds = array<i64: 128, 128>}, {pipeline_mode = #tpu.pipeline_mode<synchronous>, transform_indices = @transform_3, window_bounds = array<i64: 128, 128>}, {transform_indices = @transform_4, window_bounds = array<i64: 8, 128>}]} {
    %c0 = arith.constant 0 : index
    %c0_0 = arith.constant 0 : index
    %0 = vector.load %arg1[%c0, %c0_0] : memref<8x128xf32, #tpu.memory_space<vmem>>, vector<8x128xf32>
    %c0_1 = arith.constant 0 : index
    %c0_2 = arith.constant 0 : index
    %1 = vector.load %arg2[%c0_1, %c0_2] : memref<128x128xf32, #tpu.memory_space<vmem>>, vector<128x128xf32>
    %cst = arith.constant dense<0.000000e+00> : vector<8x128xf32>
    %2 = tpu.matmul %0, %1, %cst {dimension_numbers = #tpu.dot_dimension_numbers<[1], [0], [0], [1], [0, 0, 1, 1], [], []>} : vector<8x128xf32>, vector<128x128xf32>, vector<8x128xf32> -> vector<8x128xf32>
    %c0_3 = arith.constant 0 : index
    %c0_4 = arith.constant 0 : index
    %3 = vector.load %arg3[%c0_3, %c0_4] : memref<128x128xf32, #tpu.memory_space<vmem>>, vector<128x128xf32>
    %cst_5 = arith.constant dense<0.000000e+00> : vector<8x128xf32>
    %4 = tpu.matmul %2, %3, %cst_5 {dimension_numbers = #tpu.dot_dimension_numbers<[1], [0], [0], [1], [0, 0, 1, 1], [], []>} : vector<8x128xf32>, vector<128x128xf32>, vector<8x128xf32> -> vector<8x128xf32>
    %c0_6 = arith.constant 0 : index
    %c0_7 = arith.constant 0 : index
    %5 = vector.load %arg4[%c0_6, %c0_7] : memref<128x128xf32, #tpu.memory_space<vmem>>, vector<128x128xf32>
    %cst_8 = arith.constant dense<0.000000e+00> : vector<8x128xf32>
    %6 = tpu.matmul %4, %5, %cst_8 {dimension_numbers = #tpu.dot_dimension_numbers<[1], [0], [0], [1], [0, 0, 1, 1], [], []>} : vector<8x128xf32>, vector<128x128xf32>, vector<8x128xf32> -> vector<8x128xf32>
    %c0_9 = arith.constant 0 : index
    %c0_10 = arith.constant 0 : index
    %7 = vector.load %arg5[%c0_9, %c0_10] : memref<8x128xf32, #tpu.memory_space<vmem>>, vector<8x128xf32>
    tpu.vector_store %arg5[%c0_9, %c0_10], %6 {strides = array<i32>} : memref<8x128xf32, #tpu.memory_space<vmem>>, vector<8x128xf32>,
    return
  }
  func.func @transform_0(%arg0: i32) -> (i32, i32) {
    %c0_i32 = arith.constant 0 : i32
    %c0_i32_0 = arith.constant 0 : i32
    return %arg0, %c0_i32 : i32, i32
  }
  func.func @transform_1(%arg0: i32) -> (i32, i32) {
    %c0_i32 = arith.constant 0 : i32
    %c0_i32_0 = arith.constant 0 : i32
    %c0_i32_1 = arith.constant 0 : i32
    return %c0_i32, %c0_i32_0 : i32, i32
  }
  func.func @transform_2(%arg0: i32) -> (i32, i32) {
    %c0_i32 = arith.constant 0 : i32
    %c0_i32_0 = arith.constant 0 : i32
    %c0_i32_1 = arith.constant 0 : i32
    return %c0_i32, %c0_i32_0 : i32, i32
  }
  func.func @transform_3(%arg0: i32) -> (i32, i32) {
    %c0_i32 = arith.constant 0 : i32
    %c0_i32_0 = arith.constant 0 : i32
    %c0_i32_1 = arith.constant 0 : i32
    return %c0_i32, %c0_i32_0 : i32, i32
  }
  func.func @transform_4(%arg0: i32) -> (i32, i32) {
    %c0_i32 = arith.constant 0 : i32
    %c0_i32_0 = arith.constant 0 : i32
    return %arg0, %c0_i32 : i32, i32
  }
}

</mosaic_0001>

<bundles_post_ra>
// kernel: linear_n_depth_forward.1
= control target key start
LH: loop header
LB: loop body
LE: loop exit
PB: predicated region body
PF: predicated region fallthrough
CT: control target
= control target key end

     0   :  { %9 = vsyncpa [#allocation3], 0  ;;  %s797_s0 = inlined_call_operand.vmem [shape: f32[8,128], index: 0, kind: input, shape index: {}]   ;;  %s798_s1 = inlined_call_operand.hbm [shape: f32[128,128], index: 1, kind: input, shape index: {}]   ;;  %s799_s2 = inlined_call_operand.hbm [shape: f32[128,128], index: 2, kind: input, shape index: {}]   ;;  %s800_s3 = inlined_call_operand.hbm [shape: f32[128,128], index: 3, kind: input, shape index: {}]   ;;  %s801_s4 = inlined_call_operand.hbm [shape: f32[8,128], index: 4, kind: output, shape index: {}]  }
   0x1   :  { %10 = vsyncpa [#allocation6], 0 }
   0x2   :  { %11 = vsyncpa [#allocation4], 0  ;;  %s666_s15 = smov [#allocation5]   ;;  %s667_s17 = smov [#allocation2]  }
   0x3   :  { %s31_s16 = sshll.u32 %s666_s15, 4  ;;  %s19_s18 = sshll.u32 %s667_s17, 4  ;;  %s32_s16 = int_to_ptr.vmem [resolvable:$true] %s31_s16  ;;  %s700_s18 = int_to_ptr.vmem [resolvable:$true] %s19_s18 }
   0x4   :  { %s572_s21 = scalar_lea.hbm %s799_s2, 2048 }
   0x5   :  { %p573_p0 = scmp.ne.s32.totalorder %s799_s2, %s572_s21  ;;  %p576_p1 = scmp.lt.u32.totalorder %s572_s21, %s799_s2 }
   0x7   :  { %p578_p2 = pnand %p576_p1, %p573_p0 }
   0x9   :  { %581 = shalt.err (!%p578_p2)
}
   0xa   :  { %s582_s26 = scalar_lea.vmem %s32_s16, 2048  ;;  %p587_p4 = scmp.lt.s32.totalorder %s32_s16, %s32_s16 }
   0xb   :  { %p583_p3 = scmp.ne.s32.totalorder %s32_s16, %s582_s26  ;;  %p588_p5 = scmp.lt.s32.totalorder %s582_s26, %s582_s26 }
   0xd   :  { %p589_p6 = por %p588_p5, %p587_p4 }
   0xf   :  { %p590_p7 = pnand %p589_p6, %p583_p3 }
  0x11   :  { %593 = shalt.err (!%p590_p7)
}
  0x12   :  { %s668_s27 = smov 128   ;;  %s669_s28 = smov 8  }
  0x13   :  { %37 = dma.hbm_to_vmem [thread:$0]  %s799_s2, 2048, %s32_s16, [#allocation6], %s668_s27, %s668_s27, %s669_s28  }
  0x14   :  { %s594_s7 = scalar_lea.hbm %s798_s1, 2048 }
  0x15   :  { %p595_p8 = scmp.ne.s32.totalorder %s798_s1, %s594_s7  ;;  %p598_p9 = scmp.lt.u32.totalorder %s594_s7, %s798_s1 }
  0x17   :  { %p600_p10 = pnand %p598_p9, %p595_p8 }
  0x19   :  { %603 = shalt.err (!%p600_p10)
}
  0x1a   :  { %s604_s12 = scalar_lea.vmem %s700_s18, 2048  ;;  %p609_p12 = scmp.lt.s32.totalorder %s700_s18, %s700_s18 }
  0x1b   :  { %p605_p11 = scmp.ne.s32.totalorder %s700_s18, %s604_s12  ;;  %p610_p13 = scmp.lt.s32.totalorder %s604_s12, %s604_s12 }
  0x1d   :  { %p611_p0 = por %p610_p13, %p609_p12 }
  0x1f   :  { %p612_p1 = pnand %p611_p0, %p605_p11 }
  0x21   :  { %615 = shalt.err (!%p612_p1)
}
  0x22   :  { %25 = dma.hbm_to_vmem [thread:$0]  %s798_s1, 2048, %s700_s18, [#allocation3], %s668_s27, %s668_s27, %s669_s28  }
  0x23   :  { %s670_s14 = smov [#allocation7]   ;;  %s616_s19 = scalar_lea.hbm %s800_s3, 2048 }
  0x24   :  { %s43_s15 = sshll.u32 %s670_s14, 4  ;;  %p617_p2 = scmp.ne.s32.totalorder %s800_s3, %s616_s19  ;;  %s44_s15 = int_to_ptr.vmem [resolvable:$true] %s43_s15 }
  0x25   :  { %p620_p3 = scmp.lt.u32.totalorder %s616_s19, %s800_s3 }
  0x27   :  { %p622_p4 = pnand %p620_p3, %p617_p2 }
  0x29   :  { %625 = shalt.err (!%p622_p4)
}
  0x2a   :  { %s626_s24 = scalar_lea.vmem %s44_s15, 2048  ;;  %p631_p6 = scmp.lt.s32.totalorder %s44_s15, %s44_s15 }
  0x2b   :  { %p627_p5 = scmp.ne.s32.totalorder %s44_s15, %s626_s24  ;;  %p632_p7 = scmp.lt.s32.totalorder %s626_s24, %s626_s24 }
  0x2d   :  { %p633_p8 = por %p632_p7, %p631_p6 }
  0x2f   :  { %p634_p9 = pnand %p633_p8, %p627_p5 }
  0x31   :  { %637 = shalt.err (!%p634_p9)
}
  0x32   :  { %49 = dma.hbm_to_vmem [thread:$0]  %s800_s3, 2048, %s44_s15, [#allocation6], %s668_s27, %s668_s27, %s669_s28  }
  0x33   :  { %660 = dma.done.wait [#allocation3], 2048  }
  0x34   :  { %661 = vsyncadd [#allocation3], 4294965248 }
  0x35   :  { %662 = dma.done.wait [#allocation6], 4096  }
  0x36   :  { %663 = vsyncadd [#allocation6], 4294963200  ;;  %v671_v0 = vmov 0.0|0.0   ;;  %vm672_vm0 = vmmov 0   ;;  %v673_v1 = vmov 0.0   ;;  %v60_v2 = vld [vmem:[#allocation2] sm:$0xff] }
  0x37   :  { %491 = vmatprep.subr.bf16.mxu0 %v671_v0  ;;  %418 = vmatprep.mubr.msk.f32.mxu0 %vm672_vm0, %v673_v1  ;;  %v61_v3 = vld [vmem:[#allocation2 + $0x8] sm:$0xff]  ;;  %v62_v4 = vld [vmem:[#allocation2 + $0x10] sm:$0xff]  ;;  %v63_v6 = vld [vmem:[#allocation2 + $0x18] sm:$0xff] }
  0x38   :  { %515 = vmatprep.subr.bf16.mxu1 %v671_v0  ;;  %453 = vmatprep.mubr.msk.f32.mxu1 %vm672_vm0, %v673_v1  ;;  %v492_v5 = vpack.c.bf16 %v61_v3, %v60_v2  ;;  %v495_v7 = vpack.c.bf16 %v63_v6, %v62_v4  ;;  %v64_v8 = vld [vmem:[#allocation2 + $0x20] sm:$0xff]  ;;  %v65_v9 = vld [vmem:[#allocation2 + $0x28] sm:$0xff]  ;;  %v148_v12 = vld [vmem:[#allocation5 + $0x10] sm:$0xff] }
  0x39   :  { %v146_v10 = vld [vmem:[#allocation5] sm:$0xff]  ;;  %v147_v11 = vld [vmem:[#allocation5 + $0x8] sm:$0xff]  ;;  %v149_v13 = vld [vmem:[#allocation5 + $0x18] sm:$0xff]  ;;  %v498_v14 = vpack.c.bf16 %v65_v9, %v64_v8 }
  0x3a   :  { %493 = vmatpush3.bf16.msra.mxu0 %v492_v5  ;;  %v516_v15 = vpack.c.bf16 %v147_v11, %v146_v10  ;;  %v66_v16 = vld [vmem:[#allocation2 + $0x30] sm:$0xff]  ;;  %v67_v17 = vld [vmem:[#allocation2 + $0x38] sm:$0xff]  ;;  %v519_v18 = vpack.c.bf16 %v149_v13, %v148_v12  ;;  %v150_v19 = vld [vmem:[#allocation5 + $0x20] sm:$0xff] }
  0x3b   :  { %494 = vmatprep.subr.bf16.mxu0 %v671_v0  ;;  %v151_v20 = vld [vmem:[#allocation5 + $0x28] sm:$0xff]  ;;  %v501_v21 = vpack.c.bf16 %v67_v17, %v66_v16  ;;  %v68_v22 = vld [vmem:[#allocation2 + $0x40] sm:$0xff]  ;;  %v152_v25 = vld [vmem:[#allocation5 + $0x30] sm:$0xff] }
  0x3c   :  { %517 = vmatpush3.bf16.msra.mxu1 %v516_v15  ;;  %v69_v23 = vld [vmem:[#allocation2 + $0x48] sm:$0xff]  ;;  %v522_v24 = vpack.c.bf16 %v151_v20, %v150_v19  ;;  %v153_v26 = vld [vmem:[#allocation5 + $0x38] sm:$0xff]  ;;  %v70_v28 = vld [vmem:[#allocation2 + $0x50] sm:$0xff] }
  0x3d   :  { %518 = vmatprep.subr.bf16.mxu1 %v671_v0  ;;  %v504_v27 = vpack.c.bf16 %v69_v23, %v68_v22  ;;  %v71_v29 = vld [vmem:[#allocation2 + $0x58] sm:$0xff]  ;;  %v525_v30 = vpack.c.bf16 %v153_v26, %v152_v25  ;;  %v154_v31 = vld [vmem:[#allocation5 + $0x40] sm:$0xff]  ;;  %v155_v32 = vld [vmem:[#allocation5 + $0x48] sm:$0xff] }
  0x3e   :  { %496 = vmatpush3.bf16.msra.mxu0 %v495_v7  ;;  %v507_v33 = vpack.c.bf16 %v71_v29, %v70_v28  ;;  %v72_v34 = vld [vmem:[#allocation2 + $0x60] sm:$0xff]  ;;  %v73_v35 = vld [vmem:[#allocation2 + $0x68] sm:$0xff]  ;;  %v528_v36 = vpack.c.bf16 %v155_v32, %v154_v31  ;;  %v156_v37 = vld [vmem:[#allocation5 + $0x50] sm:$0xff] }
  0x3f   :  { %497 = vmatprep.subr.bf16.mxu0 %v671_v0  ;;  %v157_v38 = vld [vmem:[#allocation5 + $0x58] sm:$0xff]  ;;  %v510_v39 = vpack.c.bf16 %v73_v35, %v72_v34  ;;  %v74_v40 = vld [vmem:[#allocation2 + $0x70] sm:$0xff]  ;;  %v158_v43 = vld [vmem:[#allocation5 + $0x60] sm:$0xff] }
  0x40   :  { %520 = vmatpush3.bf16.msra.mxu1 %v519_v18  ;;  %v75_v41 = vld [vmem:[#allocation2 + $0x78] sm:$0xff]  ;;  %v531_v42 = vpack.c.bf16 %v157_v38, %v156_v37  ;;  %v159_v44 = vld [vmem:[#allocation5 + $0x68] sm:$0xff]  ;;  %v160_v47 = vld [vmem:[#allocation5 + $0x70] sm:$0xff] }
  0x41   :  { %521 = vmatprep.subr.bf16.mxu1 %v671_v0  ;;  %v513_v45 = vpack.c.bf16 %v75_v41, %v74_v40  ;;  %v534_v46 = vpack.c.bf16 %v159_v44, %v158_v43  ;;  %v161_v48 = vld [vmem:[#allocation5 + $0x78] sm:$0xff]  ;;  %v59_v49 = vld [vmem:[%s797_s0] sm:$0xff]  ;;  %v233_v52 = vld [vmem:[#allocation7 + $0x8] sm:$0xff]  ;;  %s674_s0 = smov [#allocation8]  }
  0x42   :  { %499 = vmatpush3.bf16.msra.mxu0 %v498_v14  ;;  %v537_v50 = vpack.c.bf16 %v161_v48, %v160_v47  ;;  %v232_v51 = vld [vmem:[#allocation7] sm:$0xff]  ;;  %v234_v53 = vld [vmem:[#allocation7 + $0x10] sm:$0xff]  ;;  %v235_v55 = vld [vmem:[#allocation7 + $0x18] sm:$0xff]  ;;  %s325_s26 = sshll.u32 %s674_s0, 4  ;;  %s326_s26 = int_to_ptr.vmem [resolvable:$true] %s325_s26 }
  0x43   :  { %500 = vmatprep.subr.bf16.mxu0 %v671_v0  ;;  %v540_v54 = vpack.c.bf16 %v233_v52, %v232_v51  ;;  %v543_v56 = vpack.c.bf16 %v235_v55, %v234_v53  ;;  %v236_v57 = vld [vmem:[#allocation7 + $0x20] sm:$0xff]  ;;  %v237_v58 = vld [vmem:[#allocation7 + $0x28] sm:$0xff]  ;;  %v238_v60 = vld [vmem:[#allocation7 + $0x30] sm:$0xff]  ;;  %s638_s27 = scalar_lea.vmem %s326_s26, 128  ;;  %p643_p11 = scmp.lt.s32.totalorder %s326_s26, %s326_s26 }
  0x44   :  { %523 = vmatpush3.bf16.msra.mxu1 %v522_v24  ;;  %v546_v59 = vpack.c.bf16 %v237_v58, %v236_v57  ;;  %v239_v61 = vld [vmem:[#allocation7 + $0x38] sm:$0xff]  ;;  %v240_v63 = vld [vmem:[#allocation7 + $0x40] sm:$0xff]  ;;  %v242_v3 = vld [vmem:[#allocation7 + $0x50] sm:$0xff]  ;;  %p639_p10 = scmp.ne.s32.totalorder %s326_s26, %s638_s27  ;;  %p644_p12 = scmp.lt.s32.totalorder %s638_s27, %s638_s27 }
  0x45   :  { %524 = vmatprep.subr.bf16.mxu1 %v671_v0  ;;  %v549_v62 = vpack.c.bf16 %v239_v61, %v238_v60  ;;  %v243_v4 = vld [vmem:[#allocation7 + $0x58] sm:$0xff]  ;;  %v244_v6 = vld [vmem:[#allocation7 + $0x60] sm:$0xff]  ;;  %v245_v7 = vld [vmem:[#allocation7 + $0x68] sm:$0xff] }
  0x46   :  { %502 = vmatpush3.bf16.msra.mxu0 %v501_v21  ;;  %v555_v5 = vpack.c.bf16 %v243_v4, %v242_v3  ;;  %v558_v8 = vpack.c.bf16 %v245_v7, %v244_v6  ;;  %v246_v9 = vld [vmem:[#allocation7 + $0x70] sm:$0xff]  ;;  %v247_v10 = vld [vmem:[#allocation7 + $0x78] sm:$0xff]  ;;  %p645_p13 = por %p644_p12, %p643_p11 }
  0x47   :  { %503 = vmatprep.subr.bf16.mxu0 %v671_v0  ;;  %v561_v11 = vpack.c.bf16 %v247_v10, %v246_v9 }
  0x48   :  { %526 = vmatpush3.bf16.msra.mxu1 %v525_v30  ;;  %p646_p0 = pnand %p645_p13, %p639_p10 }
  0x49   :  { %527 = vmatprep.subr.bf16.mxu1 %v671_v0 }
  0x4a   :  { %505 = vmatpush3.bf16.msra.mxu0 %v504_v27 }
  0x4b   :  { %506 = vmatprep.subr.bf16.mxu0 %v671_v0 }
  0x4c   :  { %529 = vmatpush3.bf16.msra.mxu1 %v528_v36 }
  0x4d   :  { %530 = vmatprep.subr.bf16.mxu1 %v671_v0 }
  0x4e   :  { %508 = vmatpush3.bf16.msra.mxu0 %v507_v33 }
  0x4f   :  { %509 = vmatprep.subr.bf16.mxu0 %v671_v0 }
  0x50   :  { %532 = vmatpush3.bf16.msra.mxu1 %v531_v42 }
  0x51   :  { %533 = vmatprep.subr.bf16.mxu1 %v671_v0 }
  0x52   :  { %511 = vmatpush3.bf16.msra.mxu0 %v510_v39 }
  0x53   :  { %512 = vmatprep.subr.bf16.mxu0 %v671_v0 }
  0x54   :  { %535 = vmatpush3.bf16.msra.mxu1 %v534_v46 }
  0x55   :  { %536 = vmatprep.subr.bf16.mxu1 %v671_v0 }
  0x56   :  { %514 = vmatpush3.bf16.msra.mxu0 %v513_v45 }
  0x57   :  { %539 = vmatprep.subr.bf16.mxu0 %v671_v0 }
  0x58   :  { %538 = vmatpush3.bf16.msra.mxu1 %v537_v50 }
  0x59   :  { %419 = vmatmul.mubr.f32.vlgmr.msra.gmra.mrb[0].mxu0 %v59_v49 }
  0x5a   :  { %488 = vmatprep.mubr.msk.f32.mxu0 %vm672_vm0, %v673_v1  ;;  %541 = vmatpush3.bf16.msra.mxu0 %v540_v54  ;;  %v241_v1 = vld [vmem:[#allocation7 + $0x48] sm:$0xff] }
  0x5b   :  { %542 = vmatprep.subr.bf16.mxu0 %v671_v0  ;;  %v552_v2 = vpack.c.bf16 %v241_v1, %v240_v63 }
  0x5e   :  { %544 = vmatpush3.bf16.msra.mxu0 %v543_v56 }
  0x5f   :  { %545 = vmatprep.subr.bf16.mxu0 %v671_v0 }
  0x62   :  { %547 = vmatpush3.bf16.msra.mxu0 %v546_v59 }
  0x63   :  { %548 = vmatprep.subr.bf16.mxu0 %v671_v0 }
  0x66   :  { %550 = vmatpush3.bf16.msra.mxu0 %v549_v62 }
  0x67   :  { %551 = vmatprep.subr.bf16.mxu0 %v671_v0 }
  0x6a   :  { %553 = vmatpush3.bf16.msra.mxu0 %v552_v2 }
  0x6b   :  { %554 = vmatprep.subr.bf16.mxu0 %v671_v0 }
  0x6e   :  { %556 = vmatpush3.bf16.msra.mxu0 %v555_v5 }
  0x6f   :  { %557 = vmatprep.subr.bf16.mxu0 %v671_v0 }
  0x72   :  { %559 = vmatpush3.bf16.msra.mxu0 %v558_v8 }
  0x73   :  { %560 = vmatprep.subr.bf16.mxu0 %v671_v0 }
  0x76   :  { %562 = vmatpush3.bf16.msra.mxu0 %v561_v11 }
 0x12c   :  { %v142_v12 = vpop.f32.mrb[0].mxu0 }
 0x12d   :  { %v420_v13 = vpop.f32.mrb[1].mxu0  ;;  %454 = vmatmul.mubr.f32.vlgmr.msra.gmra.mrb[0].mxu1 %v142_v12 }
 0x200   :  { %v228_v14 = vpop.f32.mrb[0].mxu1 }
 0x201   :  { %v455_v15 = vpop.f32.mrb[1].mxu1  ;;  %489 = vmatmul.mubr.f32.vlgmr.msra.gmra.mrb[2].mxu0 %v228_v14 }
 0x2d4   :  { %v314_v16 = vpop.f32.mrb[2].mxu0 }
 0x2d5   :  { %318 = vst [vmem:[#allocation8] sm:$0xff] %v314_v16  ;;  %v490_v17 = vpop.f32.mrb[3].mxu0 }
 0x2d6   :  { %649 = shalt.err (!%p646_p0)
}
 0x2d7   :  { %s650_s30 = scalar_lea.hbm %s801_s4, 128 }
 0x2d8   :  { %p651_p1 = scmp.ne.s32.totalorder %s801_s4, %s650_s30  ;;  %p654_p2 = scmp.lt.u32.totalorder %s650_s30, %s801_s4 }
 0x2da   :  { %p656_p3 = pnand %p654_p2, %p651_p1 }
 0x2dc   :  { %659 = shalt.err (!%p656_p3)
}
 0x2dd   :  { %328 = dma.vmem_to_hbm [thread:$0]  %s326_s26, 128, %s801_s4, [#allocation4]  }
 0x2de   :  { %664 = dma.done.wait [#allocation4], 128  }
 0x2df   :  { %665 = vsyncadd [#allocation4], 4294967168 }
 0x2e0   :  { %332 = vsyncpa [#allocation3], 1 }
 0x2e1   :  { %333 = vsyncpa [#allocation6], 1 }
 0x2e2   :  { %334 = vsyncpa [#allocation4], 1 }

</bundles_post_ra>
